<compile_context>
chip_gen: v6e
topology: v6e:2x2x1
jax: 0.10.0
libtpu: 0.0.40
codegen_flags: <defaults>
</compile_context>

<pallas_src>
import jax
import jax.numpy as jnp
import numpy as np
from jax.experimental import pallas as pl
from jax.experimental.pallas import tpu as pltpu

_LANE = 128
_SUBLANE = 8
_MAX_COLS = 16384
_MAX_TILE_BYTES = 2 << 20   # 2 MiB blocks: in+out, double-buffered << any VMEM limit


# ----------------------------------------------------------------------------
# Primary path: zero-DMA aliased no-op.
# ----------------------------------------------------------------------------
def _noop_kernel(x_ref, o_ref):
    # x_ref and o_ref alias the same HBM buffer; mark the output as produced
    # without moving a single byte.
    del x_ref
    pltpu.touch(o_ref)


def _noop_identity(x: jax.Array) -> jax.Array:
    return pl.pallas_call(
        _noop_kernel,
        out_shape=jax.ShapeDtypeStruct(x.shape, x.dtype),
        in_specs=[pl.BlockSpec(memory_space=pl.ANY)],
        out_specs=pl.BlockSpec(memory_space=pl.ANY),
        input_output_aliases={0: 0},
        compiler_params=pltpu.CompilerParams(has_side_effects=True),
        cost_estimate=pl.CostEstimate(flops=0, transcendentals=0,
                                      bytes_accessed=0),
    )(x)


_NOOP_OK = None


def _noop_supported() -> bool:
    """One-time probe: does the zero-DMA aliased no-op lower AND return the
    aliased data on this backend? Falls back to the tiled copy otherwise."""
    global _NOOP_OK
    if _NOOP_OK is None:
        try:
            probe = jnp.full((_SUBLANE, _LANE), 3.0, jnp.float32)
            out = jax.block_until_ready(_noop_identity(probe))
            _NOOP_OK = bool(jnp.all(out == 3.0))
        except Exception:   # lowering / compile failure -> use the copy path
            _NOOP_OK = False
    return _NOOP_OK


# ----------------------------------------------------------------------------
# Fallback path: tiled, lane-dense identity copy at HBM roofline.
# ----------------------------------------------------------------------------
def _copy_kernel(x_ref, o_ref):
    o_ref[...] = x_ref[...]


def _copy_identity(x: jax.Array) -> jax.Array:
    cost = pl.CostEstimate(flops=0, transcendentals=0,
                           bytes_accessed=2 * x.nbytes)
    n = x.size
    itemsize = x.dtype.itemsize

    if n == 0 or n % _LANE != 0:
        # Escape hatch: whole array as a single full-extent block (fine for
        # small activations; the zero-DMA path above is the normal route).
        # TODO(synk): tile this branch for >8 MiB tensors whose element count
        # is not a multiple of 128.
        return pl.pallas_call(
            _copy_kernel,
            out_shape=jax.ShapeDtypeStruct(x.shape, x.dtype),
            cost_estimate=cost,
        )(x)

    # Lane-dense 2D view: widest power-of-two multiple of 128 that divides n
    # while keeping rows >= 8, so sublanes stay fully used and stores are
    # unmasked `vst`s.
    cols = _LANE
    c = _LANE * 2
    while c <= _MAX_COLS and n % c == 0 and (n // c) >= _SUBLANE:
        cols = c
        c *= 2
    rows = n // cols

    # Largest multiple-of-8 row block under the 2 MiB cap; non-dividing blocks
    # are fine (Pallas handles the ragged last block), so awkward row counts
    # can never blow past the cap or scoped VMEM.
    max_block = max(_SUBLANE,
                    (_MAX_TILE_BYTES // (cols * itemsize)) // _SUBLANE * _SUBLANE)
    block_rows = rows if rows <= max_block else max_block
    grid = (pl.cdiv(rows, block_rows),)

    spec = pl.BlockSpec((block_rows, cols), lambda i: (i, 0))
    out2 = pl.pallas_call(
        _copy_kernel,
        out_shape=jax.ShapeDtypeStruct((rows, cols), x.dtype),
        grid=grid,
        in_specs=[spec],
        out_specs=spec,
        compiler_params=pltpu.CompilerParams(
            dimension_semantics=("parallel",),   # shards grid steps across TCs on v7x
        ),
        cost_estimate=cost,
    )(x.reshape(rows, cols))
    return out2.reshape(x.shape)


# ----------------------------------------------------------------------------
# PrintLayer.forward
# ----------------------------------------------------------------------------
def print_layer_forward(x: jax.Array) -> jax.Array:
    """Pallas equivalent of PrintLayer.forward: print x[0].shape, return x."""
    # Host-side side effect on static shape metadata, like `print(x[0].shape)`.
    # Under jax.jit this fires once per trace rather than per call.
    print(tuple(x.shape[1:]))

    if _noop_supported():
        return _noop_identity(x)
    return _copy_identity(x)


if __name__ == "__main__":
    key = jax.random.PRNGKey(0)
    # Small NCHW activation consistent with PrintLayer sitting in a conv net.
    x = jax.random.normal(key, (2, 4, 16, 16), dtype=jnp.float32)
    x_np = np.asarray(x)        # host snapshot BEFORE any (potentially donating) call

    # Eager call: prints per call, identity on data (alias satisfied via a
    # defensive copy since x stays live).
    y = jax.block_until_ready(print_layer_forward(x))
    assert y.shape == x.shape and y.dtype == x.dtype
    assert np.array_equal(np.asarray(y), x_np)

    # Fast path: jit + donated input realizes input_output_aliases={0: 0}, so
    # the layer moves zero bytes. Only donate when the aliased no-op path is in
    # use; do not read `x` again after this call.
    donate = (0,) if _noop_supported() else ()
    fwd = jax.jit(print_layer_forward, donate_argnums=donate)
    y2 = jax.block_until_ready(fwd(x))
    assert y2.shape == x_np.shape and y2.dtype == x_np.dtype
    assert np.array_equal(np.asarray(y2), x_np)

    print("KERNEL_OK")
</pallas_src>

<mosaic_0001>
module attributes {stable_mosaic.version = 11 : i64} {
  func.func @_noop_kernel(%arg0: memref<8x128xf32, #tpu.memory_space<any>>, %arg1: memref<8x128xf32, #tpu.memory_space<any>>) attributes {dimension_semantics = [], scalar_prefetch = 0 : i64, scratch_operands = 0 : i64, tpu.core_type = #tpu.core_type<tc>} {
    return
  }
}

module attributes {stable_mosaic.version = 11 : i64} {
  func.func @_copy_kernel(%arg0: i32, %arg1: memref<8x256xf32, #tpu.memory_space<vmem>>, %arg2: memref<8x256xf32, #tpu.memory_space<vmem>>) attributes {dimension_semantics = [#tpu.dimension_semantics<parallel>], iteration_bounds = array<i64: 1>, scalar_prefetch = 0 : i64, scratch_operands = 0 : i64, tpu.core_type = #tpu.core_type<tc>, window_params = [{transform_indices = @transform_0, window_bounds = array<i64: 8, 256>}, {transform_indices = @transform_1, window_bounds = array<i64: 8, 256>}]} {
    %c0 = arith.constant 0 : index
    %c0_0 = arith.constant 0 : index
    %0 = vector.load %arg1[%c0, %c0_0] : memref<8x256xf32, #tpu.memory_space<vmem>>, vector<8x256xf32>
    %c0_1 = arith.constant 0 : index
    %c0_2 = arith.constant 0 : index
    %1 = vector.load %arg2[%c0_1, %c0_2] : memref<8x256xf32, #tpu.memory_space<vmem>>, vector<8x256xf32>
    tpu.vector_store %arg2[%c0_1, %c0_2], %0 {strides = array<i32>} : memref<8x256xf32, #tpu.memory_space<vmem>>, vector<8x256xf32>,
    return
  }
  func.func @transform_0(%arg0: i32) -> (i32, i32) {
    %c0_i32 = arith.constant 0 : i32
    %c0_i32_0 = arith.constant 0 : i32
    return %arg0, %c0_i32 : i32, i32
  }
  func.func @transform_1(%arg0: i32) -> (i32, i32) {
    %c0_i32 = arith.constant 0 : i32
    %c0_i32_0 = arith.constant 0 : i32
    return %arg0, %c0_i32 : i32, i32
  }
}

</mosaic_0001>

<bundles_post_ra>
// kernel: tpu_custom_call.1
= control target key start
LH: loop header
LB: loop body
LE: loop exit
PB: predicated region body
PF: predicated region fallthrough
CT: control target
= control target key end

     0   :  { %s16_s0 = inlined_call_operand.hbm [shape: f32[8,128], index: 0, kind: input, shape index: {}, may-alias: {0,1}]   ;;  %s17_s1 = inlined_call_operand.hbm [shape: f32[8,128], index: 1, kind: output, shape index: {}, may-alias: {0,1}]  }

// kernel: tpu_custom_call.1
= control target key start
LH: loop header
LB: loop body
LE: loop exit
PB: predicated region body
PF: predicated region fallthrough
CT: control target
= control target key end

     0   :  { %6 = vsyncpa [#allocation3], 0  ;;  %s104_s0 = inlined_call_operand.hbm [shape: f32[8,256], index: 0, kind: input, shape index: {}]   ;;  %s105_s1 = inlined_call_operand.hbm [shape: f32[8,256], index: 1, kind: output, shape index: {}]  }
   0x1   :  { %7 = vsyncpa [#allocation4], 0  ;;  %s86_s6 = smov [#allocation2]  }
   0x2   :  { %s14_s7 = sshll.u32 %s86_s6, 4  ;;  %s15_s7 = int_to_ptr.vmem [resolvable:$true] %s14_s7 }
   0x3   :  { %s50_s8 = scalar_lea.vmem %s15_s7, 256  ;;  %p55_p1 = scmp.lt.s32.totalorder %s15_s7, %s15_s7 }
   0x4   :  { %p51_p0 = scmp.ne.s32.totalorder %s15_s7, %s50_s8  ;;  %p56_p2 = scmp.lt.s32.totalorder %s50_s8, %s50_s8 }
   0x6   :  { %p57_p3 = por %p56_p2, %p55_p1 }
   0x8   :  { %p58_p4 = pnand %p57_p3, %p51_p0 }
   0xa   :  { %61 = shalt.err (!%p58_p4)
}
   0xb   :  { %17 = dma.hbm_to_vmem [thread:$0]  %s104_s0, 256, %s15_s7, [#allocation3]  }
   0xc   :  { %82 = dma.done.wait [#allocation3], 256  }
   0xd   :  { %83 = vsyncadd [#allocation3], 4294967040  ;;  %s87_s11 = smov [#allocation5]   ;;  %v21_v0 = vld [vmem:[#allocation2] sm:$0xff]  ;;  %v22_v1 = vld [vmem:[#allocation2 + $0x8] sm:$0xff] }
   0xe   :  { %s31_s12 = sshll.u32 %s87_s11, 4  ;;  %23 = vst [vmem:[#allocation5] sm:$0xff] %v21_v0  ;;  %24 = vst [vmem:[#allocation5 + $0x8] sm:$0xff] %v22_v1  ;;  %s32_s12 = int_to_ptr.vmem [resolvable:$true] %s31_s12 }
   0xf   :  { %s62_s13 = scalar_lea.vmem %s32_s12, 256  ;;  %p67_p6 = scmp.lt.s32.totalorder %s32_s12, %s32_s12 }
  0x10   :  { %p63_p5 = scmp.ne.s32.totalorder %s32_s12, %s62_s13  ;;  %p68_p7 = scmp.lt.s32.totalorder %s62_s13, %s62_s13 }
  0x12   :  { %p69_p8 = por %p68_p7, %p67_p6 }
  0x14   :  { %p70_p9 = pnand %p69_p8, %p63_p5 }
  0x16   :  { %73 = shalt.err (!%p70_p9)
}
  0x17   :  { %34 = dma.vmem_to_hbm [thread:$0]  %s32_s12, 256, %s105_s1, [#allocation4]  }
  0x18   :  { %84 = dma.done.wait [#allocation4], 256  }
  0x19   :  { %85 = vsyncadd [#allocation4], 4294967040 }
  0x1a   :  { %38 = vsyncpa [#allocation3], 1 }
  0x1b   :  { %39 = vsyncpa [#allocation4], 1 }

</bundles_post_ra>
